<compile_context>
chip_gen: v7x
topology: tpu7x:2x2x1
jax: 0.10.0
libtpu: 0.0.40
codegen_flags: <defaults>
</compile_context>

<pallas_src>
import functools

import jax
import jax.numpy as jnp
from jax.experimental import pallas as pl
from jax.experimental.pallas import tpu as pltpu


def dqnbase_kernel(x_ref, w_ref, b_ref, o_ref):
    # Linear + ReLU hot path: MXU matmul with f32 accumulation, f32 epilogue.
    acc = jnp.dot(x_ref[...], w_ref[...], preferred_element_type=jnp.float32)
    acc = acc + b_ref[...].astype(jnp.float32)      # (1, N) broadcast over (tm, N)
    o_ref[...] = jnp.maximum(acc, 0.0).astype(o_ref.dtype)


@functools.partial(jax.jit, static_argnames=("block_b",))
def dqnbase_forward(x, w, b, *, block_b=None):
    """Pallas implementation of DQNBase.forward: relu(x @ W + b).

    x: (B, input_dims) float32
    w: (input_dims, 512) float32   (transposed PyTorch nn.Linear weight)
    b: (1, 512) float32
    returns: (B, 512) float32
    """
    B, K = x.shape
    K2, N = w.shape
    assert K == K2
    out_dtype = x.dtype

    # Single block when the batch is small (grid collapses to one step, nothing to
    # pipeline); for large batches, 256-row batch tiles with the weight resident.
    if block_b is None:
        block_b = B if B <= 256 else 256

    # Pad the batch so it tiles evenly (shapes are static under jit).
    Bp = ((B + block_b - 1) // block_b) * block_b
    if Bp != B:
        x = jnp.pad(x, ((0, Bp - B), (0, 0)))

    grid = (Bp // block_b,)
    out = pl.pallas_call(
        dqnbase_kernel,
        out_shape=jax.ShapeDtypeStruct((Bp, N), out_dtype),
        grid_spec=pltpu.PrefetchScalarGridSpec(
            num_scalar_prefetch=0,
            grid=grid,
            in_specs=[
                # x: one batch tile per grid step (the only streamed operand).
                pl.BlockSpec((block_b, K), lambda i: (i, 0)),
                # w, b: constant index_map -> resident across the whole grid.
                pl.BlockSpec((K, N), lambda i: (0, 0)),
                pl.BlockSpec((1, N), lambda i: (0, 0)),
            ],
            # Full 512-lane-wide output slab -> unmasked vector stores.
            out_specs=pl.BlockSpec((block_b, N), lambda i: (i, 0)),
        ),
        compiler_params=pltpu.CompilerParams(
            # Batch tiles are independent -> megacore-shardable on v7x.
            dimension_semantics=("parallel",)),
    )(x, w, b)

    if Bp != B:
        out = out[:B]
    return out


def init_dqnbase_params(key, input_dims, hidden=512, dtype=jnp.float32):
    """Matches the module's initialize_weights_he:
    torch.nn.init.kaiming_uniform_(weight) with defaults (a=0, mode='fan_in',
    leaky_relu gain = sqrt(2), so bound = sqrt(2) * sqrt(3 / fan_in)) and
    torch.nn.init.constant_(bias, 0)."""
    fan_in = input_dims
    bound = float(jnp.sqrt(2.0) * jnp.sqrt(3.0 / fan_in))
    # PyTorch weight is (hidden, input_dims); we keep the transposed (K, N) layout.
    w = jax.random.uniform(key, (input_dims, hidden), dtype=dtype,
                           minval=-bound, maxval=bound)
    b = jnp.zeros((1, hidden), dtype=dtype)
    return w, b


if __name__ == "__main__":
    key = jax.random.PRNGKey(0)
    k_w, k_x, k_x2 = jax.random.split(key, 3)

    batch = 8          # small batch -> single-block (grid collapses to one step)
    input_dims = 32
    hidden = 512       # fixed by the module

    w, b = init_dqnbase_params(k_w, input_dims, hidden)
    x = jax.random.normal(k_x, (batch, input_dims), dtype=jnp.float32)

    out = dqnbase_forward(x, w, b)
    out = jax.block_until_ready(out)

    ref = jnp.maximum(x @ w + b, 0.0)
    assert out.shape == (batch, hidden)
    assert jnp.allclose(out, ref, atol=1e-5, rtol=1e-5)

    # Also exercise the batch-tiled + padded path (as used for large vectorized-env
    # batches), still at a modest size.
    x2 = jax.random.normal(k_x2, (300, input_dims), dtype=jnp.float32)
    out2 = jax.block_until_ready(dqnbase_forward(x2, w, b, block_b=128))
    ref2 = jnp.maximum(x2 @ w + b, 0.0)
    assert out2.shape == (300, hidden)
    assert jnp.allclose(out2, ref2, atol=1e-5, rtol=1e-5)

    print("KERNEL_OK")
</pallas_src>

<mosaic_0001>
module attributes {stable_mosaic.version = 11 : i64} {
  func.func @dqnbase_kernel(%arg0: i32, %arg1: memref<8x32xf32, #tpu.memory_space<vmem>>, %arg2: memref<32x512xf32, #tpu.memory_space<vmem>>, %arg3: memref<1x512xf32, #tpu.memory_space<vmem>>, %arg4: memref<8x512xf32, #tpu.memory_space<vmem>>) attributes {dimension_semantics = [#tpu.dimension_semantics<parallel>], iteration_bounds = array<i64: 1>, scalar_prefetch = 0 : i64, scratch_operands = 0 : i64, tpu.core_type = #tpu.core_type<tc>, window_params = [{transform_indices = @transform_0, window_bounds = array<i64: 8, 32>}, {pipeline_mode = #tpu.pipeline_mode<synchronous>, transform_indices = @transform_1, window_bounds = array<i64: 32, 512>}, {pipeline_mode = #tpu.pipeline_mode<synchronous>, transform_indices = @transform_2, window_bounds = array<i64: 1, 512>}, {transform_indices = @transform_3, window_bounds = array<i64: 8, 512>}]} {
    %c0 = arith.constant 0 : index
    %c0_0 = arith.constant 0 : index
    %0 = vector.load %arg1[%c0, %c0_0] : memref<8x32xf32, #tpu.memory_space<vmem>>, vector<8x32xf32>
    %c0_1 = arith.constant 0 : index
    %c0_2 = arith.constant 0 : index
    %1 = vector.load %arg2[%c0_1, %c0_2] : memref<32x512xf32, #tpu.memory_space<vmem>>, vector<32x512xf32>
    %cst = arith.constant dense<0.000000e+00> : vector<8x512xf32>
    %2 = tpu.matmul %0, %1, %cst {dimension_numbers = #tpu.dot_dimension_numbers<[1], [0], [0], [1], [0, 0, 1, 1], [], []>} : vector<8x32xf32>, vector<32x512xf32>, vector<8x512xf32> -> vector<8x512xf32>
    %c0_3 = arith.constant 0 : index
    %c0_4 = arith.constant 0 : index
    %3 = vector.load %arg3[%c0_3, %c0_4] : memref<1x512xf32, #tpu.memory_space<vmem>>, vector<1x512xf32>
    %4 = vector.broadcast %3 : vector<1x512xf32> to vector<8x512xf32>
    %5 = arith.addf %2, %4 : vector<8x512xf32>
    %cst_5 = arith.constant 0.000000e+00 : f32
    %6 = vector.broadcast %cst_5 : f32 to vector<8x512xf32>
    %7 = arith.maximumf %5, %6 : vector<8x512xf32>
    %c0_6 = arith.constant 0 : index
    %c0_7 = arith.constant 0 : index
    %8 = vector.load %arg4[%c0_6, %c0_7] : memref<8x512xf32, #tpu.memory_space<vmem>>, vector<8x512xf32>
    tpu.vector_store %arg4[%c0_6, %c0_7], %7 {strides = array<i32>} : memref<8x512xf32, #tpu.memory_space<vmem>>, vector<8x512xf32>,
    return
  }
  func.func @transform_0(%arg0: i32) -> (i32, i32) {
    %c0_i32 = arith.constant 0 : i32
    %c0_i32_0 = arith.constant 0 : i32
    return %arg0, %c0_i32 : i32, i32
  }
  func.func @transform_1(%arg0: i32) -> (i32, i32) {
    %c0_i32 = arith.constant 0 : i32
    %c0_i32_0 = arith.constant 0 : i32
    %c0_i32_1 = arith.constant 0 : i32
    return %c0_i32, %c0_i32_0 : i32, i32
  }
  func.func @transform_2(%arg0: i32) -> (i32, i32) {
    %c0_i32 = arith.constant 0 : i32
    %c0_i32_0 = arith.constant 0 : i32
    %c0_i32_1 = arith.constant 0 : i32
    return %c0_i32, %c0_i32_0 : i32, i32
  }
  func.func @transform_3(%arg0: i32) -> (i32, i32) {
    %c0_i32 = arith.constant 0 : i32
    %c0_i32_0 = arith.constant 0 : i32
    return %arg0, %c0_i32 : i32, i32
  }
}

</mosaic_0001>

<bundles_post_ra>
// kernel: dqnbase_forward.1
= control target key start
LH: loop header
LB: loop body
LE: loop exit
PB: predicated region body
PF: predicated region fallthrough
CT: control target
= control target key end

     0   :  { %8 = vsyncpa [#allocation3], 0  ;;  %s418_s0 = inlined_call_operand.hbm [shape: f32[8,32], index: 0, kind: input, shape index: {}]   ;;  %s419_s1 = inlined_call_operand.hbm [shape: f32[32,512], index: 1, kind: input, shape index: {}]   ;;  %s420_s2 = inlined_call_operand.vmem [shape: f32[1,512], index: 2, kind: input, shape index: {}]   ;;  %s421_s3 = inlined_call_operand.hbm [shape: f32[8,512], index: 3, kind: output, shape index: {}]  }
   0x1   :  { %9 = vsyncpa [#allocation6], 0 }
   0x2   :  { %10 = vsyncpa [#allocation4], 0  ;;  %s346_s12 = smov [#allocation2]   ;;  %s347_s14 = smov [#allocation5]  }
   0x3   :  { %s17_s13 = sshll.u32 %s346_s12, 4  ;;  %s26_s15 = sshll.u32 %s347_s14, 4  ;;  %s18_s13 = int_to_ptr.vmem [resolvable:$true] %s17_s13  ;;  %s372_s15 = int_to_ptr.vmem [resolvable:$true] %s26_s15 }
   0x4   :  { %s274_s18 = scalar_lea.hbm %s418_s0, 128 }
   0x5   :  { %p275_p0 = scmp.ne.s32.totalorder %s418_s0, %s274_s18  ;;  %p278_p1 = scmp.lt.u32.totalorder %s274_s18, %s418_s0 }
   0x7   :  { %p280_p2 = pnand %p278_p1, %p275_p0 }
   0x9   :  { %283 = shalt.err (!%p280_p2)
}
   0xa   :  { %s284_s23 = scalar_lea.vmem %s18_s13, 128  ;;  %p289_p4 = scmp.lt.s32.totalorder %s18_s13, %s18_s13 }
   0xb   :  { %p285_p3 = scmp.ne.s32.totalorder %s18_s13, %s284_s23  ;;  %p290_p5 = scmp.lt.s32.totalorder %s284_s23, %s284_s23 }
   0xd   :  { %p291_p6 = por %p290_p5, %p289_p4 }
   0xf   :  { %p292_p7 = pnand %p291_p6, %p285_p3 }
  0x11   :  { %295 = shalt.err (!%p292_p7)
}
  0x12   :  { %20 = dma.hbm_to_vmem [thread:$0]  %s418_s0, 128, %s18_s13, [#allocation3]  }
  0x13   :  { %s296_s28 = scalar_lea.hbm %s419_s1, 2048 }
  0x14   :  { %p297_p8 = scmp.ne.s32.totalorder %s419_s1, %s296_s28  ;;  %p300_p9 = scmp.lt.u32.totalorder %s296_s28, %s419_s1 }
  0x16   :  { %p302_p10 = pnand %p300_p9, %p297_p8 }
  0x18   :  { %305 = shalt.err (!%p302_p10)
}
  0x19   :  { %s306_s6 = scalar_lea.vmem %s372_s15, 2048  ;;  %p311_p12 = scmp.lt.s32.totalorder %s372_s15, %s372_s15 }
  0x1a   :  { %p307_p11 = scmp.ne.s32.totalorder %s372_s15, %s306_s6  ;;  %p312_p13 = scmp.lt.s32.totalorder %s306_s6, %s306_s6 }
  0x1c   :  { %p313_p0 = por %p312_p13, %p311_p12 }
  0x1e   :  { %p314_p1 = pnand %p313_p0, %p307_p11 }
  0x20   :  { %317 = shalt.err (!%p314_p1)
}
  0x21   :  { %s348_s0 = smov 512   ;;  %s349_s7 = smov 32  }
  0x22   :  { %32 = dma.hbm_to_vmem [thread:$0]  %s419_s1, 2048, %s372_s15, [#allocation6], %s348_s0, %s348_s0, %s349_s7  }
  0x23   :  { %340 = dma.done.wait [#allocation3], 128  }
  0x24   :  { %341 = vsyncadd [#allocation3], 4294967168 }
  0x25   :  { %342 = dma.done.wait [#allocation6], 2048  }
  0x26   :  { %343 = vsyncadd [#allocation6], 4294965248  ;;  %v350_v0 = vmov 0.0   ;;  %v43_v1 = vld [vmem:[#allocation5 + $0x8] sm:$0xff]  ;;  %v45_v3 = vld [vmem:[#allocation5 + $0x18] sm:$0xff]  ;;  %vm80_vm0 = vcmask 261120   ;;  %v60_v26 = vlaneseq }
  0x27   :  { %148 = vmatprep.mubr.f32.mxu0 %v350_v0  ;;  %219 = vmatprep.mubr.f32.mxu1 %v350_v0  ;;  %v47_v2 = vld [vmem:[#allocation5 + $0x28] sm:$0xff]  ;;  %v49_v5 = vld [vmem:[#allocation5 + $0x38] sm:$0xff]  ;;  %v42_v6 = vld [vmem:[#allocation5] sm:$0xff]  ;;  %s351_s11 = smov [#allocation7]  }
  0x28   :  { %v252_v4 = vpack.c.bf16 %v47_v2, %v43_v1  ;;  %v46_v7 = vld [vmem:[#allocation5 + $0x20] sm:$0xff]  ;;  %v260_v8 = vpack.c.bf16 %v49_v5, %v45_v3  ;;  %v44_v10 = vld [vmem:[#allocation5 + $0x10] sm:$0xff]  ;;  %v51_v12 = vld [vmem:[#allocation5 + $0x48] sm:$0xff]  ;;  %v61_v27 = vshrl.u32 %v60_v26, 7  ;;  %s240_s12 = sshll.u32 %s351_s11, 4  ;;  %s241_s12 = int_to_ptr.vmem [resolvable:$true] %s240_s12 }
  0x29   :  { %v254_v9 = vpack.c.bf16 %v46_v7, %v42_v6  ;;  %v48_v11 = vld [vmem:[#allocation5 + $0x30] sm:$0xff]  ;;  %v55_v14 = vld [vmem:[#allocation5 + $0x68] sm:$0xff]  ;;  %v53_v15 = vld [vmem:[#allocation5 + $0x58] sm:$0xff]  ;;  %p323_p3 = scmp.lt.s32.totalorder %s241_s12, %s241_s12 }
  0x2a   :  { %253 = vmatprep.subr.bf16.mxu0 %v252_v4  ;;  %v262_v13 = vpack.c.bf16 %v48_v11, %v44_v10  ;;  %v57_v16 = vld [vmem:[#allocation5 + $0x78] sm:$0xff]  ;;  %261 = vmatprep.subr.bf16.mxu1 %v260_v8  ;;  %v256_v17 = vpack.c.bf16 %v55_v14, %v51_v12  ;;  %v50_v19 = vld [vmem:[#allocation5 + $0x40] sm:$0xff]  ;;  %v52_v21 = vld [vmem:[#allocation5 + $0x50] sm:$0xff]  ;;  %v62_v28 = vsub.s32 0, %v61_v27  ;;  %v70_v30 = vsub.s32 2, %v61_v27 }
  0x2b   :  { %255 = vmatpush1.bf16.msra.mxu0 %v254_v9  ;;  %v264_v18 = vpack.c.bf16 %v57_v16, %v53_v15  ;;  %v54_v20 = vld [vmem:[#allocation5 + $0x60] sm:$0xff]  ;;  %v56_v23 = vld [vmem:[#allocation5 + $0x70] sm:$0xff]  ;;  %v41_v25 = vld [vmem:[#allocation2] sm:$0xff]  ;;  %v66_v31 = vsub.s32 1, %v61_v27  ;;  %v74_v32 = vsub.s32 3, %v61_v27 }
  0x2c   :  { %263 = vmatpush1.bf16.msra.mxu1 %v262_v13  ;;  %v258_v22 = vpack.c.bf16 %v54_v20, %v50_v19  ;;  %257 = vmatprep.subr.bf16.mxu0 %v256_v17  ;;  %v266_v24 = vpack.c.bf16 %v56_v23, %v52_v21  ;;  %v58_v29 = vld [vmem:[%s420_s2] sm:$0xf]  ;;  %s318_s2 = scalar_lea.vmem %s241_s12, 512 }
  0x2d   :  { %265 = vmatprep.subr.bf16.mxu1 %v264_v18  ;;  %v63_v33 = vrot.slane %v58_v29, %v62_v28  ;;  %v71_v34 = vrot.slane %v58_v29, %v70_v30  ;;  %v67_v35 = vrot.slane %v58_v29, %v66_v31  ;;  %v75_v36 = vrot.slane %v58_v29, %v74_v32  ;;  %p319_p2 = scmp.ne.s32.totalorder %s241_s12, %s318_s2  ;;  %p324_p4 = scmp.lt.s32.totalorder %s318_s2, %s318_s2 }
  0x2f   :  { %259 = vmatpush1.bf16.msra.mxu0 %v258_v22  ;;  %p325_p5 = por %p324_p4, %p323_p3 }
  0x30   :  { %267 = vmatpush1.bf16.msra.mxu1 %v266_v24 }
  0x31   :  { %p326_p6 = pnand %p325_p5, %p319_p2 }
  0x32   :  { %250 = vmatmul.mubr.msk.f32.vlgmr.msra.gmra.mrb[0].mxu0 %vm80_vm0, %v41_v25 }
  0x33   :  { %251 = vmatmul.mubr.msk.f32.vlgmr.msra.gmra.mrb[0].mxu1 %vm80_vm0, %v41_v25 }
 0x105   :  { %v150_v37 = vpop.f32.mrb[0].mxu0 }
 0x106   :  { %v151_v38 = vadd.f32 %v150_v37, %v63_v33  ;;  %v221_v39 = vpop.f32.mrb[0].mxu1  ;;  %v152_v40 = vpop.f32.mrb[1].mxu0 }
 0x107   :  { %v222_v41 = vadd.f32 %v221_v39, %v71_v34  ;;  %v153_v42 = vadd.f32 %v152_v40, %v67_v35  ;;  %v223_v43 = vpop.f32.mrb[1].mxu1 }
 0x108   :  { %v226_v44 = vmax.f32 %v151_v38, 0.0  ;;  %v224_v45 = vadd.f32 %v223_v43, %v75_v36 }
 0x109   :  { %v228_v46 = vmax.f32 %v222_v41, 0.0  ;;  %v227_v47 = vmax.f32 %v153_v42, 0.0 }
 0x10a   :  { %230 = vst [vmem:[#allocation7] sm:$0xff] %v226_v44  ;;  %v229_v48 = vmax.f32 %v224_v45, 0.0 }
 0x10b   :  { %232 = vst [vmem:[#allocation7 + $0x10] sm:$0xff] %v228_v46  ;;  %231 = vst [vmem:[#allocation7 + $0x8] sm:$0xff] %v227_v47 }
 0x10c   :  { %233 = vst [vmem:[#allocation7 + $0x18] sm:$0xff] %v229_v48 }
 0x10d   :  { %329 = shalt.err (!%p326_p6)
}
 0x10e   :  { %s330_s15 = scalar_lea.hbm %s421_s3, 512 }
 0x10f   :  { %p331_p7 = scmp.ne.s32.totalorder %s421_s3, %s330_s15  ;;  %p334_p8 = scmp.lt.u32.totalorder %s330_s15, %s421_s3 }
 0x111   :  { %p336_p9 = pnand %p334_p8, %p331_p7 }
 0x113   :  { %339 = shalt.err (!%p336_p9)
}
 0x114   :  { %243 = dma.vmem_to_hbm [thread:$0]  %s241_s12, 512, %s421_s3, [#allocation4]  }
 0x115   :  { %344 = dma.done.wait [#allocation4], 512  }
 0x116   :  { %345 = vsyncadd [#allocation4], 4294966784 }
 0x117   :  { %247 = vsyncpa [#allocation3], 1 }
 0x118   :  { %248 = vsyncpa [#allocation6], 1 }
 0x119   :  { %249 = vsyncpa [#allocation4], 1 }

</bundles_post_ra>
